<compile_context>
chip_gen: v6e
topology: v6e:2x2x1
jax: 0.10.0
libtpu: 0.0.40
codegen_flags: <defaults>
</compile_context>

<pallas_src>
import functools

import numpy as np
import jax
import jax.numpy as jnp
from jax import lax
from jax.experimental import pallas as pl
from jax.experimental.pallas import tpu as pltpu


def _round_up(x, m):
    return (x + m - 1) // m * m


def ae_loss_kernel(tag_ref, idx_ref, vis_ref, out_ref, s1_ref, s2_ref,
                   *, loss_type, m, k, tile_n):
    n = pl.program_id(1)
    n_tiles = pl.num_programs(1)

    @pl.when(n == 0)
    def _init():
        s1_ref[...] = jnp.zeros_like(s1_ref)
        s2_ref[...] = jnp.zeros_like(s2_ref)

    tag = tag_ref[0]                     # (TILE_N, 1) f32, tag values on sublanes
    idx = idx_ref[0]                     # (1, MKp)   i32, flattened joint indices
    vis = vis_ref[0]                     # (1, MKp)   f32, visibility (0/1)
    mkp = idx.shape[-1]

    # --- accumulate per-joint sufficient statistics for this N-tile ---
    base = n * tile_n
    pos = base + lax.broadcasted_iota(jnp.int32, (tile_n, mkp), 0)   # flat heatmap index
    w = jnp.where(pos == idx, vis, 0.0)                              # (TILE_N, MKp)
    s1_ref[...] += jnp.sum(w * tag, axis=0, keepdims=True)           # sum vis * tag[idx]
    s2_ref[...] += jnp.sum(w * (tag * tag), axis=0, keepdims=True)   # sum vis * tag[idx]^2

    # --- epilogue: per-person stats, pull term + masked pairwise push term ---
    @pl.when(n == n_tiles - 1)
    def _finalize():
        s1 = s1_ref[...]                 # (1, MKp)
        s2 = s2_ref[...]                 # (1, MKp)

        # person-grouping matrix G[p, j] = 1 iff joint j belongs to person p
        # (lane-padding joints j >= M*K match no person)
        pid = lax.broadcasted_iota(jnp.int32, (m, mkp), 0)
        jid = lax.broadcasted_iota(jnp.int32, (m, mkp), 1)
        lo = pid * k
        g = jnp.where((jid >= lo) & (jid < lo + k), 1.0, 0.0)        # (M, MKp)

        dn = (((1,), (1,)), ((), ()))    # contract last dims (MXU-friendly)
        cnt_r = lax.dot_general(vis, g, dn, preferred_element_type=jnp.float32)  # (1, M)
        s1_r = lax.dot_general(s1, g, dn, preferred_element_type=jnp.float32)    # (1, M)
        s2_r = lax.dot_general(s2, g, dn, preferred_element_type=jnp.float32)    # (1, M)
        cnt_c = lax.dot_general(g, vis, dn, preferred_element_type=jnp.float32)  # (M, 1)
        s1_c = lax.dot_general(g, s1, dn, preferred_element_type=jnp.float32)    # (M, 1)

        valid_r = cnt_r > 0.0                                         # person has visible joints
        safe_r = jnp.maximum(cnt_r, 1.0)
        mean_r = s1_r / safe_r
        # pull variance from sufficient statistics, clamped vs fp cancellation
        pull_p = jnp.maximum(s2_r / safe_r - mean_r * mean_r, 0.0)
        pull_p = jnp.where(valid_r, pull_p, 0.0)
        num_tags = jnp.sum(jnp.where(valid_r, 1.0, 0.0), axis=1, keepdims=True)  # (1,1)
        pull_sum = jnp.sum(pull_p, axis=1, keepdims=True)                        # (1,1)

        valid_c = cnt_c > 0.0
        mean_c = jnp.where(valid_c, s1_c / jnp.maximum(cnt_c, 1.0), 0.0)  # (M, 1)
        mean_rm = jnp.where(valid_r, mean_r, 0.0)                         # (1, M)
        diff = mean_c - mean_rm                                           # (M, M)
        pair = valid_c & valid_r                                          # (M, M)
        if loss_type == "exp":
            contrib = jnp.exp(-(diff * diff))
        elif loss_type == "max":
            contrib = jnp.maximum(1.0 - jnp.abs(diff), 0.0)
        else:
            raise ValueError("Unkown ae loss type")
        push_sum = jnp.sum(jnp.where(pair, contrib, 0.0), axis=1, keepdims=True)  # (M,1)
        push_sum = jnp.sum(push_sum, axis=0, keepdims=True) - num_tags            # drop diagonal

        denom = jnp.maximum((num_tags - 1.0) * num_tags, 1.0)
        push = jnp.where(num_tags >= 2.0, push_sum / denom * 0.5, 0.0)            # (1,1)
        pull = jnp.where(num_tags >= 1.0,
                         pull_sum / jnp.maximum(num_tags, 1.0), 0.0)              # (1,1)

        lane = lax.broadcasted_iota(jnp.int32, (1, 128), 1)
        out_ref[0] = jnp.where(lane == 0, push, jnp.where(lane == 1, pull, 0.0))


@functools.partial(jax.jit, static_argnames=("loss_type", "tile_n"))
def ae_loss(tags, joints, loss_type="exp", tile_n=1024):
    """tags: (B, N, 1) float; joints: (B, M, K, 2) int -> (push (B,), pull (B,))."""
    B, N, tag_dim = tags.shape
    if tag_dim != 1:
        # TODO(synk): tag_dim > 1 (vector embeddings) not supported by this kernel.
        raise NotImplementedError("ae_loss kernel assumes tag_dim == 1")
    _, M, K, _ = joints.shape
    MK = M * K
    MKp = _round_up(MK, 128)                       # lane-dense flattened joint axis

    tile_n = max(128, (int(tile_n) // 128) * 128)
    TILE_N = min(tile_n, _round_up(N, 128))
    N_pad = _round_up(N, TILE_N)
    NT = N_pad // TILE_N

    tag = tags.astype(jnp.float32)                 # (B, N, 1)
    if N_pad != N:
        tag = jnp.pad(tag, ((0, 0), (0, N_pad - N), (0, 0)))

    idx = joints[..., 0].astype(jnp.int32).reshape(B, 1, MK)
    # visibility; also mask out-of-range indices so they are neither gathered nor counted
    vis = ((joints[..., 1] > 0) & (joints[..., 0] >= 0) & (joints[..., 0] < N))
    vis = vis.astype(jnp.float32).reshape(B, 1, MK)
    if MKp != MK:
        idx = jnp.pad(idx, ((0, 0), (0, 0), (0, MKp - MK)))
        vis = jnp.pad(vis, ((0, 0), (0, 0), (0, MKp - MK)))

    kern = functools.partial(ae_loss_kernel, loss_type=loss_type,
                             m=M, k=K, tile_n=TILE_N)
    cost = pl.CostEstimate(
        flops=int(4 * B * MKp * N_pad + 10 * B * MKp * M),
        transcendentals=int(B * M * M) if loss_type == "exp" else 0,
        bytes_accessed=int(4 * (B * N_pad + 2 * B * MKp + B * 128)))

    out = pl.pallas_call(
        kern,
        out_shape=jax.ShapeDtypeStruct((B, 1, 128), jnp.float32),
        grid_spec=pltpu.PrefetchScalarGridSpec(
            num_scalar_prefetch=0,
            grid=(B, NT),
            in_specs=[
                pl.BlockSpec((1, TILE_N, 1), lambda b, n: (b, n, 0)),   # tag tile
                pl.BlockSpec((1, 1, MKp), lambda b, n: (b, 0, 0)),      # joint indices
                pl.BlockSpec((1, 1, MKp), lambda b, n: (b, 0, 0)),      # visibility
            ],
            out_specs=pl.BlockSpec((1, 1, 128), lambda b, n: (b, 0, 0)),
            scratch_shapes=[pltpu.VMEM((1, MKp), jnp.float32),          # S1 accumulator
                            pltpu.VMEM((1, MKp), jnp.float32)],         # S2 accumulator
        ),
        compiler_params=pltpu.CompilerParams(
            dimension_semantics=("parallel", "arbitrary"),
            vmem_limit_bytes=48 * 1024 * 1024,
        ),
        cost_estimate=cost,
    )(tag, idx, vis)

    return out[:, 0, 0], out[:, 0, 1]


def ref_ae_loss(tags, joints, loss_type="exp"):
    """NumPy reference mirroring the PyTorch AELoss loops."""
    tags = np.asarray(tags, np.float32)
    joints = np.asarray(joints)
    pushes, pulls = [], []
    for b in range(tags.shape[0]):
        pred_tag = tags[b]                                    # (N, 1)
        per_tags, pull = [], 0.0
        for person in joints[b]:
            tmp = [pred_tag[int(j[0])] for j in person if j[1] > 0]
            if len(tmp) == 0:
                continue
            tmp = np.stack(tmp)                               # (nv, 1)
            m = tmp.mean(axis=0)                              # (1,)
            per_tags.append(m)
            pull = pull + ((tmp - m) ** 2).mean()
        n = len(per_tags)
        if n == 0:
            pushes.append(0.0); pulls.append(0.0); continue
        if n == 1:
            pushes.append(0.0); pulls.append(pull / n); continue
        t = np.stack(per_tags)                                # (n, 1)
        A = np.broadcast_to(t, (n, n))
        diff = A - A.T
        if loss_type == "exp":
            push = np.exp(-diff ** 2).sum() - n
        else:
            push = np.clip(1.0 - np.abs(diff), 0.0, None).sum() - n
        pushes.append(push / ((n - 1) * n) * 0.5)
        pulls.append(pull / n)
    return np.asarray(pushes, np.float32), np.asarray(pulls, np.float32)


if __name__ == "__main__":
    # small shapes; N=512 with tile_n=128 exercises the 4-tile reduction path
    B, M, K, N = 2, 4, 8, 512

    key = jax.random.PRNGKey(0)
    k1, k2, k3 = jax.random.split(key, 3)
    tags = jax.random.normal(k1, (B, N, 1), dtype=jnp.float32)
    idx = jax.random.randint(k2, (B, M, K), 0, N, dtype=jnp.int32)
    vis = jax.random.bernoulli(k3, 0.7, (B, M, K)).astype(jnp.int32)
    # edge cases: one fully-invisible person, and one image with a single valid person
    vis = vis.at[0, 3, :].set(0)
    vis = vis.at[1, 1:, :].set(0)
    vis = vis.at[1, 0, 0].set(1)
    joints = jnp.stack([idx, vis], axis=-1).astype(jnp.int32)   # (B, M, K, 2)

    for lt in ("exp", "max"):
        push, pull = ae_loss(tags, joints, loss_type=lt, tile_n=128)
        push = np.asarray(jax.block_until_ready(push))
        pull = np.asarray(jax.block_until_ready(pull))
        ref_push, ref_pull = ref_ae_loss(tags, joints, loss_type=lt)
        np.testing.assert_allclose(push, ref_push, rtol=1e-4, atol=1e-5)
        np.testing.assert_allclose(pull, ref_pull, rtol=1e-4, atol=1e-5)

    print("KERNEL_OK")
</pallas_src>

<mosaic_0001>
module attributes {stable_mosaic.version = 11 : i64} {
  func.func @ae_loss_kernel(%arg0: i32, %arg1: i32, %arg2: memref<1x128x1xf32, #tpu.memory_space<vmem>>, %arg3: memref<1x1x128xi32, #tpu.memory_space<vmem>>, %arg4: memref<1x1x128xf32, #tpu.memory_space<vmem>>, %arg5: memref<1x1x128xf32, #tpu.memory_space<vmem>>, %arg6: memref<1x128xf32, #tpu.memory_space<vmem>>, %arg7: memref<1x128xf32, #tpu.memory_space<vmem>>) attributes {dimension_semantics = [#tpu.dimension_semantics<parallel>, #tpu.dimension_semantics<arbitrary>], iteration_bounds = array<i64: 2, 4>, scalar_prefetch = 0 : i64, scratch_operands = 2 : i64, tpu.core_type = #tpu.core_type<tc>, window_params = [{transform_indices = @transform_0, window_bounds = array<i64: 1, 128, 1>}, {transform_indices = @transform_1, window_bounds = array<i64: 1, 1, 128>}, {transform_indices = @transform_2, window_bounds = array<i64: 1, 1, 128>}, {transform_indices = @transform_3, window_bounds = array<i64: 1, 1, 128>}]} {
    %c0_i32 = arith.constant 0 : i32
    %0 = arith.cmpi eq, %arg1, %c0_i32 : i32
    %1 = arith.extui %0 : i1 to i32
    %c0_i32_0 = arith.constant 0 : i32
    %2 = arith.cmpi ne, %1, %c0_i32_0 : i32
    scf.if %2 {
      %cst_20 = arith.constant 0.000000e+00 : f32
      %37 = vector.broadcast %cst_20 : f32 to vector<1x128xf32>
      %c0_21 = arith.constant 0 : index
      %c0_22 = arith.constant 0 : index
      %38 = vector.load %arg6[%c0_21, %c0_22] : memref<1x128xf32, #tpu.memory_space<vmem>>, vector<1x128xf32>
      tpu.vector_store %arg6[%c0_21, %c0_22], %37 {strides = array<i32>} : memref<1x128xf32, #tpu.memory_space<vmem>>, vector<1x128xf32>,
      %cst_23 = arith.constant 0.000000e+00 : f32
      %39 = vector.broadcast %cst_23 : f32 to vector<1x128xf32>
      %c0_24 = arith.constant 0 : index
      %c0_25 = arith.constant 0 : index
      %40 = vector.load %arg7[%c0_24, %c0_25] : memref<1x128xf32, #tpu.memory_space<vmem>>, vector<1x128xf32>
      tpu.vector_store %arg7[%c0_24, %c0_25], %39 {strides = array<i32>} : memref<1x128xf32, #tpu.memory_space<vmem>>, vector<1x128xf32>,
    } else {
    }
    %c0 = arith.constant 0 : index
    %c0_1 = arith.constant 0 : index
    %c0_2 = arith.constant 0 : index
    %3 = vector.load %arg2[%c0, %c0_1, %c0_2] : memref<1x128x1xf32, #tpu.memory_space<vmem>>, vector<1x128x1xf32>
    %4 = vector.shape_cast %3 : vector<1x128x1xf32> to vector<128x1xf32>
    %c0_3 = arith.constant 0 : index
    %c0_4 = arith.constant 0 : index
    %c0_5 = arith.constant 0 : index
    %5 = vector.load %arg3[%c0_3, %c0_4, %c0_5] : memref<1x1x128xi32, #tpu.memory_space<vmem>>, vector<1x1x128xi32>
    %6 = vector.shape_cast %5 : vector<1x1x128xi32> to vector<1x128xi32>
    %c0_6 = arith.constant 0 : index
    %c0_7 = arith.constant 0 : index
    %c0_8 = arith.constant 0 : index
    %7 = vector.load %arg4[%c0_6, %c0_7, %c0_8] : memref<1x1x128xf32, #tpu.memory_space<vmem>>, vector<1x1x128xf32>
    %8 = vector.shape_cast %7 : vector<1x1x128xf32> to vector<1x128xf32>
    %c128_i32 = arith.constant 128 : i32
    %9 = arith.muli %arg1, %c128_i32 : i32
    %10 = tpu.iota {dimensions = array<i32: 0>} : vector<128x128xi32>
    %11 = vector.broadcast %9 : i32 to vector<128x128xi32>
    %12 = arith.addi %11, %10 : vector<128x128xi32>
    %13 = vector.broadcast %6 : vector<1x128xi32> to vector<128x128xi32>
    %14 = arith.cmpi eq, %12, %13 : vector<128x128xi32>
    %cst = arith.constant 0.000000e+00 : f32
    %15 = vector.shape_cast %8 : vector<1x128xf32> to vector<1x128xf32>
    %16 = vector.broadcast %15 : vector<1x128xf32> to vector<128x128xf32>
    %17 = vector.broadcast %cst : f32 to vector<128x128xf32>
    %18 = arith.select %14, %16, %17 : vector<128x128xi1>, vector<128x128xf32>
    %c0_9 = arith.constant 0 : index
    %c0_10 = arith.constant 0 : index
    %19 = vector.load %arg6[%c0_9, %c0_10] : memref<1x128xf32, #tpu.memory_space<vmem>>, vector<1x128xf32>
    %20 = vector.broadcast %4 : vector<128x1xf32> to vector<128x128xf32>
    %21 = arith.mulf %18, %20 : vector<128x128xf32>
    %cst_11 = arith.constant dense<0.000000e+00> : vector<128xf32>
    %22 = vector.multi_reduction <add>, %21, %cst_11 [0] : vector<128x128xf32> to vector<128xf32>
    %23 = vector.shape_cast %22 : vector<128xf32> to vector<1x128xf32>
    %24 = arith.addf %19, %23 : vector<1x128xf32>
    %c0_12 = arith.constant 0 : index
    %c0_13 = arith.constant 0 : index
    %25 = vector.load %arg6[%c0_12, %c0_13] : memref<1x128xf32, #tpu.memory_space<vmem>>, vector<1x128xf32>
    tpu.vector_store %arg6[%c0_12, %c0_13], %24 {strides = array<i32>} : memref<1x128xf32, #tpu.memory_space<vmem>>, vector<1x128xf32>,
    %c0_14 = arith.constant 0 : index
    %c0_15 = arith.constant 0 : index
    %26 = vector.load %arg7[%c0_14, %c0_15] : memref<1x128xf32, #tpu.memory_space<vmem>>, vector<1x128xf32>
    %27 = arith.mulf %4, %4 : vector<128x1xf32>
    %28 = vector.broadcast %27 : vector<128x1xf32> to vector<128x128xf32>
    %29 = arith.mulf %18, %28 : vector<128x128xf32>
    %cst_16 = arith.constant dense<0.000000e+00> : vector<128xf32>
    %30 = vector.multi_reduction <add>, %29, %cst_16 [0] : vector<128x128xf32> to vector<128xf32>
    %31 = vector.shape_cast %30 : vector<128xf32> to vector<1x128xf32>
    %32 = arith.addf %26, %31 : vector<1x128xf32>
    %c0_17 = arith.constant 0 : index
    %c0_18 = arith.constant 0 : index
    %33 = vector.load %arg7[%c0_17, %c0_18] : memref<1x128xf32, #tpu.memory_space<vmem>>, vector<1x128xf32>
    tpu.vector_store %arg7[%c0_17, %c0_18], %32 {strides = array<i32>} : memref<1x128xf32, #tpu.memory_space<vmem>>, vector<1x128xf32>,
    %c3_i32 = arith.constant 3 : i32
    %34 = arith.cmpi eq, %arg1, %c3_i32 : i32
    %35 = arith.extui %34 : i1 to i32
    %c0_i32_19 = arith.constant 0 : i32
    %36 = arith.cmpi ne, %35, %c0_i32_19 : i32
    scf.if %36 {
      %c0_20 = arith.constant 0 : index
      %c0_21 = arith.constant 0 : index
      %37 = vector.load %arg6[%c0_20, %c0_21] : memref<1x128xf32, #tpu.memory_space<vmem>>, vector<1x128xf32>
      %c0_22 = arith.constant 0 : index
      %c0_23 = arith.constant 0 : index
      %38 = vector.load %arg7[%c0_22, %c0_23] : memref<1x128xf32, #tpu.memory_space<vmem>>, vector<1x128xf32>
      %39 = tpu.iota {dimensions = array<i32: 0>} : vector<4x128xi32>
      %40 = tpu.iota {dimensions = array<i32: 1>} : vector<4x128xi32>
      %c8_i32 = arith.constant 8 : i32
      %41 = vector.broadcast %c8_i32 : i32 to vector<4x128xi32>
      %42 = arith.muli %39, %41 : vector<4x128xi32>
      %43 = arith.cmpi sge, %40, %42 : vector<4x128xi32>
      %c8_i32_24 = arith.constant 8 : i32
      %44 = vector.broadcast %c8_i32_24 : i32 to vector<4x128xi32>
      %45 = arith.addi %42, %44 : vector<4x128xi32>
      %46 = arith.cmpi slt, %40, %45 : vector<4x128xi32>
      %47 = arith.andi %43, %46 : vector<4x128xi1>
      %cst_25 = arith.constant 1.000000e+00 : f32
      %cst_26 = arith.constant 0.000000e+00 : f32
      %48 = vector.broadcast %cst_25 : f32 to vector<4x128xf32>
      %49 = vector.broadcast %cst_26 : f32 to vector<4x128xf32>
      %50 = arith.select %47, %48, %49 : vector<4x128xi1>, vector<4x128xf32>
      %cst_27 = arith.constant dense<0.000000e+00> : vector<1x4xf32>
      %51 = tpu.matmul %8, %50, %cst_27 {dimension_numbers = #tpu.dot_dimension_numbers<[1], [1], [0], [0], [0, 0, 1, 0], [], []>} : vector<1x128xf32>, vector<4x128xf32>, vector<1x4xf32> -> vector<1x4xf32>
      %cst_28 = arith.constant dense<0.000000e+00> : vector<1x4xf32>
      %52 = tpu.matmul %37, %50, %cst_28 {dimension_numbers = #tpu.dot_dimension_numbers<[1], [1], [0], [0], [0, 0, 1, 0], [], []>} : vector<1x128xf32>, vector<4x128xf32>, vector<1x4xf32> -> vector<1x4xf32>
      %cst_29 = arith.constant dense<0.000000e+00> : vector<1x4xf32>
      %53 = tpu.matmul %38, %50, %cst_29 {dimension_numbers = #tpu.dot_dimension_numbers<[1], [1], [0], [0], [0, 0, 1, 0], [], []>} : vector<1x128xf32>, vector<4x128xf32>, vector<1x4xf32> -> vector<1x4xf32>
      %cst_30 = arith.constant dense<0.000000e+00> : vector<4x1xf32>
      %54 = tpu.matmul %50, %8, %cst_30 {dimension_numbers = #tpu.dot_dimension_numbers<[1], [1], [0], [0], [0, 0, 1, 0], [], []>} : vector<4x128xf32>, vector<1x128xf32>, vector<4x1xf32> -> vector<4x1xf32>
      %cst_31 = arith.constant dense<0.000000e+00> : vector<4x1xf32>
      %55 = tpu.matmul %50, %37, %cst_31 {dimension_numbers = #tpu.dot_dimension_numbers<[1], [1], [0], [0], [0, 0, 1, 0], [], []>} : vector<4x128xf32>, vector<1x128xf32>, vector<4x1xf32> -> vector<4x1xf32>
      %cst_32 = arith.constant 0.000000e+00 : f32
      %56 = vector.broadcast %cst_32 : f32 to vector<1x4xf32>
      %57 = arith.cmpf ogt, %51, %56 : vector<1x4xf32>
      %cst_33 = arith.constant 1.000000e+00 : f32
      %58 = vector.broadcast %cst_33 : f32 to vector<1x4xf32>
      %59 = arith.maximumf %51, %58 : vector<1x4xf32>
      %60 = arith.divf %52, %59 : vector<1x4xf32>
      %61 = arith.divf %53, %59 : vector<1x4xf32>
      %62 = arith.mulf %60, %60 : vector<1x4xf32>
      %63 = arith.subf %61, %62 : vector<1x4xf32>
      %cst_34 = arith.constant 0.000000e+00 : f32
      %64 = vector.broadcast %cst_34 : f32 to vector<1x4xf32>
      %65 = arith.maximumf %63, %64 : vector<1x4xf32>
      %cst_35 = arith.constant 0.000000e+00 : f32
      %66 = vector.broadcast %cst_35 : f32 to vector<1x4xf32>
      %67 = arith.select %57, %65, %66 : vector<1x4xi1>, vector<1x4xf32>
      %cst_36 = arith.constant 1.000000e+00 : f32
      %cst_37 = arith.constant 0.000000e+00 : f32
      %68 = vector.broadcast %cst_36 : f32 to vector<1x4xf32>
      %69 = vector.broadcast %cst_37 : f32 to vector<1x4xf32>
      %70 = arith.select %57, %68, %69 : vector<1x4xi1>, vector<1x4xf32>
      %cst_38 = arith.constant dense<0.000000e+00> : vector<1xf32>
      %71 = vector.multi_reduction <add>, %70, %cst_38 [1] : vector<1x4xf32> to vector<1xf32>
      %72 = vector.shape_cast %71 : vector<1xf32> to vector<1x1xf32>
      %cst_39 = arith.constant dense<0.000000e+00> : vector<1xf32>
      %73 = vector.multi_reduction <add>, %67, %cst_39 [1] : vector<1x4xf32> to vector<1xf32>
      %74 = vector.shape_cast %73 : vector<1xf32> to vector<1x1xf32>
      %cst_40 = arith.constant 0.000000e+00 : f32
      %75 = vector.broadcast %cst_40 : f32 to vector<4x1xf32>
      %76 = arith.cmpf ogt, %54, %75 : vector<4x1xf32>
      %cst_41 = arith.constant 1.000000e+00 : f32
      %77 = vector.broadcast %cst_41 : f32 to vector<4x1xf32>
      %78 = arith.maximumf %54, %77 : vector<4x1xf32>
      %79 = arith.divf %55, %78 : vector<4x1xf32>
      %cst_42 = arith.constant 0.000000e+00 : f32
      %80 = vector.broadcast %cst_42 : f32 to vector<4x1xf32>
      %81 = arith.select %76, %79, %80 : vector<4x1xi1>, vector<4x1xf32>
      %cst_43 = arith.constant 0.000000e+00 : f32
      %82 = vector.broadcast %cst_43 : f32 to vector<1x4xf32>
      %83 = arith.select %57, %60, %82 : vector<1x4xi1>, vector<1x4xf32>
      %84 = vector.broadcast %81 : vector<4x1xf32> to vector<4x4xf32>
      %85 = vector.broadcast %83 : vector<1x4xf32> to vector<4x4xf32>
      %86 = arith.subf %84, %85 : vector<4x4xf32>
      %87 = vector.broadcast %76 : vector<4x1xi1> to vector<4x4xi1>
      %88 = vector.broadcast %57 : vector<1x4xi1> to vector<4x4xi1>
      %89 = arith.andi %87, %88 : vector<4x4xi1>
      %90 = arith.mulf %86, %86 : vector<4x4xf32>
      %cst_44 = arith.constant 0.000000e+00 : f32
      %91 = vector.broadcast %cst_44 : f32 to vector<4x4xf32>
      %92 = arith.subf %91, %90 : vector<4x4xf32>
      %93 = math.exp %92 : vector<4x4xf32>
      %cst_45 = arith.constant 0.000000e+00 : f32
      %94 = vector.broadcast %cst_45 : f32 to vector<4x4xf32>
      %95 = arith.select %89, %93, %94 : vector<4x4xi1>, vector<4x4xf32>
      %cst_46 = arith.constant dense<0.000000e+00> : vector<4xf32>
      %96 = vector.multi_reduction <add>, %95, %cst_46 [1] : vector<4x4xf32> to vector<4xf32>
      %97 = vector.shape_cast %96 : vector<4xf32> to vector<4x1xf32>
      %cst_47 = arith.constant dense<0.000000e+00> : vector<1xf32>
      %98 = vector.multi_reduction <add>, %97, %cst_47 [0] : vector<4x1xf32> to vector<1xf32>
      %99 = vector.shape_cast %98 : vector<1xf32> to vector<1x1xf32>
      %100 = arith.subf %99, %72 : vector<1x1xf32>
      %cst_48 = arith.constant 1.000000e+00 : f32
      %101 = vector.broadcast %cst_48 : f32 to vector<1x1xf32>
      %102 = arith.subf %72, %101 : vector<1x1xf32>
      %103 = arith.mulf %102, %72 : vector<1x1xf32>
      %cst_49 = arith.constant 1.000000e+00 : f32
      %104 = vector.broadcast %cst_49 : f32 to vector<1x1xf32>
      %105 = arith.maximumf %103, %104 : vector<1x1xf32>
      %cst_50 = arith.constant 2.000000e+00 : f32
      %106 = vector.broadcast %cst_50 : f32 to vector<1x1xf32>
      %107 = arith.cmpf oge, %72, %106 : vector<1x1xf32>
      %108 = arith.divf %100, %105 : vector<1x1xf32>
      %cst_51 = arith.constant 5.000000e-01 : f32
      %109 = vector.broadcast %cst_51 : f32 to vector<1x1xf32>
      %110 = arith.mulf %108, %109 : vector<1x1xf32>
      %cst_52 = arith.constant 0.000000e+00 : f32
      %111 = vector.broadcast %cst_52 : f32 to vector<1x1xf32>
      %112 = arith.select %107, %110, %111 : vector<1x1xi1>, vector<1x1xf32>
      %cst_53 = arith.constant 1.000000e+00 : f32
      %113 = vector.broadcast %cst_53 : f32 to vector<1x1xf32>
      %114 = arith.cmpf oge, %72, %113 : vector<1x1xf32>
      %cst_54 = arith.constant 1.000000e+00 : f32
      %115 = vector.broadcast %cst_54 : f32 to vector<1x1xf32>
      %116 = arith.maximumf %72, %115 : vector<1x1xf32>
      %117 = arith.divf %74, %116 : vector<1x1xf32>
      %cst_55 = arith.constant 0.000000e+00 : f32
      %118 = vector.broadcast %cst_55 : f32 to vector<1x1xf32>
      %119 = arith.select %114, %117, %118 : vector<1x1xi1>, vector<1x1xf32>
      %120 = tpu.iota {dimensions = array<i32: 1>} : vector<1x128xi32>
      %c0_i32_56 = arith.constant 0 : i32
      %121 = vector.broadcast %c0_i32_56 : i32 to vector<1x128xi32>
      %122 = arith.cmpi eq, %120, %121 : vector<1x128xi32>
      %c1_i32 = arith.constant 1 : i32
      %123 = vector.broadcast %c1_i32 : i32 to vector<1x128xi32>
      %124 = arith.cmpi eq, %120, %123 : vector<1x128xi32>
      %cst_57 = arith.constant 0.000000e+00 : f32
      %125 = vector.shape_cast %119 : vector<1x1xf32> to vector<1x1xf32>
      %126 = vector.broadcast %125 : vector<1x1xf32> to vector<1x128xf32>
      %127 = vector.broadcast %cst_57 : f32 to vector<1x128xf32>
      %128 = arith.select %124, %126, %127 : vector<1x128xi1>, vector<1x128xf32>
      %129 = vector.shape_cast %112 : vector<1x1xf32> to vector<1x1xf32>
      %130 = vector.broadcast %129 : vector<1x1xf32> to vector<1x128xf32>
      %131 = arith.select %122, %130, %128 : vector<1x128xi1>, vector<1x128xf32>
      %c0_58 = arith.constant 0 : index
      %c0_59 = arith.constant 0 : index
      %c0_60 = arith.constant 0 : index
      %132 = vector.load %arg5[%c0_58, %c0_59, %c0_60] : memref<1x1x128xf32, #tpu.memory_space<vmem>>, vector<1x1x128xf32>
      %133 = vector.shape_cast %132 : vector<1x1x128xf32> to vector<1x128xf32>
      %134 = vector.shape_cast %131 : vector<1x128xf32> to vector<1x1x128xf32>
      tpu.vector_store %arg5[%c0_58, %c0_59, %c0_60], %134 {strides = array<i32>} : memref<1x1x128xf32, #tpu.memory_space<vmem>>, vector<1x1x128xf32>,
    } else {
    }
    return
  }
  func.func @transform_0(%arg0: i32, %arg1: i32) -> (i32, i32, i32) {
    %c0_i32 = arith.constant 0 : i32
    %c0_i32_0 = arith.constant 0 : i32
    return %arg0, %arg1, %c0_i32 : i32, i32, i32
  }
  func.func @transform_1(%arg0: i32, %arg1: i32) -> (i32, i32, i32) {
    %c0_i32 = arith.constant 0 : i32
    %c0_i32_0 = arith.constant 0 : i32
    %c0_i32_1 = arith.constant 0 : i32
    return %arg0, %c0_i32, %c0_i32_0 : i32, i32, i32
  }
  func.func @transform_2(%arg0: i32, %arg1: i32) -> (i32, i32, i32) {
    %c0_i32 = arith.constant 0 : i32
    %c0_i32_0 = arith.constant 0 : i32
    %c0_i32_1 = arith.constant 0 : i32
    return %arg0, %c0_i32, %c0_i32_0 : i32, i32, i32
  }
  func.func @transform_3(%arg0: i32, %arg1: i32) -> (i32, i32, i32) {
    %c0_i32 = arith.constant 0 : i32
    %c0_i32_0 = arith.constant 0 : i32
    %c0_i32_1 = arith.constant 0 : i32
    return %arg0, %c0_i32, %c0_i32_0 : i32, i32, i32
  }
}

</mosaic_0001>

<bundles_post_ra>
// kernel: squeeze.6
= control target key start
LH: loop header
LB: loop body
LE: loop exit
PB: predicated region body
PF: predicated region fallthrough
CT: control target
= control target key end

     0   :  { %s30_s10 = smov 3  ;;  %s11_s11 = smov 3  ;;  %vm13_vm0 = vcmask 64512   ;;  %vm20_vm1 = vcmask 261312   ;;  %vm27_vm2 = vcmask 195712   ;;  %vm34_vm3 = vcmask 130112   ;;  %s70_s0 = inlined_call_operand.vmem [shape: s32[2,4,8], index: 0, kind: input, shape index: {}]   ;;  %s71_s1 = inlined_call_operand.vmem [shape: s32[2,1,32], index: 1, kind: output, shape index: {}]  }
   0x1   :  { %v44_v0 = vld [vmem:[%s70_s0 + $0x4] sm:$0xf]  ;;  %v9_v1 = vld [vmem:[%s70_s0] sm:$0xf]  ;;  %s16_s0 = smov 3  ;;  %s23_s12 = smov 3 }
   0x2   :  { %8 = vst [vmem:[#allocation1 + $0x8] sm:$0xf] %v44_v0  ;;  %10 = vst [vmem:[#allocation1] sm:$0xf] %v9_v1  ;;  %s48_s13 = smov 24   ;;  %s49_s14 = smov 8  }
   0x3   :  { %s50_s15 = smov 16  }
   0x9   :  { %v17_v2 = vld [vmem:[#allocation1 + $0x3] ss:$8 sm:%s16_s0]   ;;  %v31_v3 = vld [vmem:[#allocation1 + $0x1] ss:$8 sm:%s30_s10]   ;;  %v12_v4 = vld [vmem:[#allocation1] ss:$8 sm:%s11_s11]  }
   0xa   :  { %18 = vrot.lane.b32.xlu0 %v17_v2, %s48_s13  ;;  %32 = vrot.lane.b32.xlu1 %v31_v3, %s49_s14  ;;  %v24_v5 = vld [vmem:[#allocation1 + $0x2] ss:$8 sm:%s23_s12]   ;;  %14 = vst.msk [vmem:[#allocation0] sm:$0x3] %vm13_vm0, %v12_v4  }
   0xe   :  { %25 = vrot.lane.b32.xlu0 %v24_v5, %s50_s15 }
  0x7c   :  { %v19_v6 = vpop.permute.xlu0 %18   ;;  %v33_v7 = vpop.permute.xlu1 %32  }
  0x7d   :  { %21 = vst.msk [vmem:[#allocation0] sm:$0x3] %vm20_vm1, %v19_v6  }
  0x80   :  { %v26_v8 = vpop.permute.xlu0 %25  }
  0x81   :  { %28 = vst.msk [vmem:[#allocation0] sm:$0x3] %vm27_vm2, %v26_v8  }
  0x82   :  { %35 = vst.msk [vmem:[#allocation0] sm:$0x3] %vm34_vm3, %v33_v7  }
  0x89   :  { %v40_v9 = vld [vmem:[#allocation0] sm:$0x3] }
  0x8a   :  { %43 = vst [vmem:[%s71_s1] sm:$0x3] %v40_v9 }

// kernel: ae_loss.1
= control target key start
LH: loop header
LB: loop body
LE: loop exit
PB: predicated region body
PF: predicated region fallthrough
CT: control target
= control target key end

     0   :  { %s1136_s12 = smov 0   ;;  %s1138_s13 = smov 0   ;;  %s1357_s0 = inlined_call_operand.vmem [shape: f32[2,512,1], index: 0, kind: input, shape index: {}]   ;;  %s1358_s1 = inlined_call_operand.vmem [shape: s32[2,1,128], index: 1, kind: input, shape index: {}]   ;;  %s1359_s2 = inlined_call_operand.vmem [shape: f32[2,1,128], index: 2, kind: input, shape index: {}]   ;;  %s1360_s3 = inlined_call_operand.vmem [shape: f32[2,1,128], index: 3, kind: output, shape index: {}]  }
   0x1   :  { %s1140_s14 = smov 0   ;;  %s1142_s15 = smov 0  }
   0x2   :  { %s1144_s16 = smov 0  }
   0x3 LB: > { %s22_s17 = sadd.s32 1, %s1100_s14  ;;  %s25_s18 = sadd.s32 1, %s1104_s15  ;;  %s1108_s16 = sphi %s1144_s16, %s13_s16   ;;  %s1104_s15 = sphi %s1142_s15, %s1364_s15   ;;  %s1100_s14 = sphi %s1140_s14, %s1363_s14   ;;  %s1096_s13 = sphi %s1138_s13, %s1362_s13   ;;  %s1092_s12 = sphi %s1136_s12, %s1361_s12  }
   0x4   : > { %p23_p0 = scmp.ge.s32.totalorder %s22_s17, 4  ;;  %p977_p1 = scmp.ge.s32.totalorder %s1108_s16, 1 }
   0x5   : > { %p172_p2 = scmp.lt.s32.totalorder %s1108_s16, 9 }
   0x6   : > { %s1366_s17 = smov (%p23_p0, %s22_s17), 0  ;;  %s1368_s18 = smov (!%p23_p0, %s25_s18), %s1104_s15 }
   0x7   : > { %p173_p3 = pnand %p977_p1, %p172_p2  ;;  %p27_p4 = scmp.ge.s32.totalorder %s1368_s18, 2 }
   0x8   : > { %s978_s19 = sshll.u32 (!%p173_p3), %s1092_s12, 4  ;;  %p205_p5 = scmp.lt.s32.totalorder (!%p173_p3), %s1096_s13, 1 }
   0x9   : > { %s1370_s18 = smov (%p27_p4, %s1368_s18), 0  ;;  %176 = sbr.rel (%p173_p3) target bundleno = 637 (0x27d), region = 32 }
   0xa   : > { %p207_p6 = scmp.lt.s32.totalorder (!%p173_p3), %s978_s19, 63  ;;  %p981_p7 = scmp.ne.s32.totalorder (!%p173_p3), %s1092_s12, 0 }
   0xe   : > { %s1372_s13 = smov (!%p205_p5, %s1096_s13), 1  ;;  %s1374_s19 = smov (!%p207_p6, %s978_s19), 63 }
   0xf   : > { %s979_s20 = sshll.u32 %s1372_s13, 6  ;;  %s216_s23 = scalar_lea.vmem %s1358_s1, %s1372_s13 }
  0x10   : > { %s210_s24 = sadd.s32 %s979_s20, %s1374_s19  ;;  %s219_s27 = scalar_lea.vmem %s1359_s2, %s1372_s13 }
  0x11   : > { %s980_s28 = sshll.u32 %s210_s24, 3  ;;  %s222_s4 = scalar_lea.vmem %s1360_s3, %s1372_s13 }
  0x12   : > { %s1187_s7 = scalar_lea.vmem %s1357_s0, %s980_s28  ;;  %226 = sbr.rel (%p981_p7) target bundleno = 25 (0x19), region = 36 }
  0x17   : > { %v1110_v0 = vmov 0.0  }
  0x18   : > { %227 = vst [vmem:[#allocation2] sm:$0x1] %v1110_v0  ;;  %228 = vst [vmem:[#allocation3] sm:$0x1] %v1110_v0 }
  0x19 PF: > { %v231_v1 = vld [vmem:[%s1187_s7 + $0x10] sm:$0xff]  ;;  %v229_v2 = vld [vmem:[%s1187_s7] sm:$0xff]  ;;  %v1111_v3 = vmov 0   ;;  %v232_v4 = vld [vmem:[%s1187_s7 + $0x18] sm:$0xff]  ;;  %v248_v38 = vlaneseq  ;;  %s982_s8 = sshll.u32 %s1092_s12, 7  ;;  %p984_p8 = scmp.ne.s32.totalorder %s1092_s12, 3 }
  0x1a   : > { %1059 = vset.pattern.permute.xlu1 %v1111_v3  ;;  %1058 = vset.pattern.permute.xlu0 %v1111_v3  ;;  %v230_v5 = vld [vmem:[%s1187_s7 + $0x8] sm:$0xff]  ;;  %v445_v6 = vmul.f32 %v229_v2, %v229_v2  ;;  %v233_v7 = vld [vmem:[%s1187_s7 + $0x20] sm:$0xff]  ;;  %v447_v8 = vmul.f32 %v231_v1, %v231_v1  ;;  %v448_v10 = vmul.f32 %v232_v4, %v232_v4  ;;  %v235_v14 = vld [vmem:[%s1187_s7 + $0x30] sm:$0xff]  ;;  %v1215_v45 = vstv %s982_s8 }
  0x1b   : > { %337 = vperm.xlu1 %1059, %v231_v1   ;;  %327 = vperm.xlu0 %1058, %v229_v2   ;;  %v446_v9 = vmul.f32 %v230_v5, %v230_v5  ;;  %v449_v11 = vmul.f32 %v233_v7, %v233_v7  ;;  %v234_v12 = vld [vmem:[%s1187_s7 + $0x28] sm:$0xff]  ;;  %v451_v15 = vmul.f32 %v235_v14, %v235_v14  ;;  %v236_v16 = vld [vmem:[%s1187_s7 + $0x38] sm:$0xff]  ;;  %v237_v18 = vld [vmem:[%s1187_s7 + $0x40] sm:$0xff]  ;;  %v1211_v41 = vshrl.u32 %v248_v38, 7 }
  0x1c   : > { %v450_v13 = vmul.f32 %v234_v12, %v234_v12  ;;  %v452_v17 = vmul.f32 %v236_v16, %v236_v16  ;;  %v453_v19 = vmul.f32 %v237_v18, %v237_v18  ;;  %v238_v20 = vld [vmem:[%s1187_s7 + $0x48] sm:$0xff]  ;;  %v239_v22 = vld [vmem:[%s1187_s7 + $0x50] sm:$0xff]  ;;  %v240_v24 = vld [vmem:[%s1187_s7 + $0x58] sm:$0xff] }
  0x1d   : > { %v454_v21 = vmul.f32 %v238_v20, %v238_v20  ;;  %v455_v23 = vmul.f32 %v239_v22, %v239_v22  ;;  %v456_v25 = vmul.f32 %v240_v24, %v240_v24  ;;  %v241_v26 = vld [vmem:[%s1187_s7 + $0x60] sm:$0xff]  ;;  %v242_v28 = vld [vmem:[%s1187_s7 + $0x68] sm:$0xff]  ;;  %v243_v30 = vld [vmem:[%s1187_s7 + $0x70] sm:$0xff]  ;;  %v250_v42 = vadd.s32 8, %v1211_v41 }
  0x1e   : > { %v457_v27 = vmul.f32 %v241_v26, %v241_v26  ;;  %v458_v29 = vmul.f32 %v242_v28, %v242_v28  ;;  %v459_v31 = vmul.f32 %v243_v30, %v243_v30  ;;  %v244_v32 = vld [vmem:[%s1187_s7 + $0x78] sm:$0xff]  ;;  %v1219_v47 = vsub.s32 0, %v1211_v41  ;;  %v1226_v50 = vld [vmem:[%s219_s27] sm:$0x1] }
  0x1f   : > { %342 = vperm.xlu1 %1059, %v232_v4   ;;  %332 = vperm.xlu0 %1058, %v230_v5   ;;  %v460_v33 = vmul.f32 %v244_v32, %v244_v32  ;;  %v267_v46 = vadd.s32 %v1215_v45, %v250_v42  ;;  %v251_v51 = vadd.s32 16, %v1211_v41  ;;  %v266_v52 = vadd.s32 %v1215_v45, %v1211_v41  ;;  %v1236_v53 = vld [vmem:[%s216_s23] ss:$0 sm:$0xff] }
  0x20   : > { %v252_v54 = vadd.s32 24, %v1211_v41  ;;  %v1242_v55 = vrot.slane %v1226_v50, %v1219_v47  ;;  %v253_v63 = vadd.s32 32, %v1211_v41  ;;  %v254_v4 = vadd.s32 40, %v1211_v41 }
  0x21   : > { %vm287_vm0 = vcmp.eq.s32.totalorder %v267_v46, %v1236_v53  ;;  %v268_v58 = vadd.s32 %v1215_v45, %v251_v51  ;;  %vm286_vm1 = vcmp.eq.s32.totalorder %v266_v52, %v1236_v53 }
  0x22   : > { %v309_v59 = vsel %vm287_vm0, %v1242_v55, 0.0  ;;  %v269_v60 = vadd.s32 %v1215_v45, %v252_v54  ;;  %v308_v62 = vsel %vm286_vm1, %v1242_v55, 0.0 }
  0x23   : > { %347 = vperm.xlu0 %1058, %v233_v7   ;;  %463 = vperm.xlu1 %1059, %v445_v6   ;;  %vm288_vm2 = vcmp.eq.s32.totalorder %v268_v58, %v1236_v53  ;;  %v255_v7 = vadd.s32 48, %v1211_v41 }
  0x24   : > { %vm289_vm3 = vcmp.eq.s32.totalorder %v269_v60, %v1236_v53  ;;  %v262_v60 = vadd.s32 104, %v1211_v41 }
  0x27   : > { %468 = vperm.xlu0 %1058, %v446_v9   ;;  %473 = vperm.xlu1 %1059, %v447_v8   ;;  %v310_v8 = vsel %vm288_vm2, %v1242_v55, 0.0  ;;  %v270_v9 = vadd.s32 %v1215_v45, %v253_v63 }
  0x29   : > { %vm290_vm4 = vcmp.eq.s32.totalorder %v270_v9, %v1236_v53 }
  0x2b   : > { %478 = vperm.xlu0 %1058, %v448_v10   ;;  %483 = vperm.xlu1 %1059, %v449_v11  }
  0x2f   : > { %352 = vperm.xlu0 %1058, %v234_v12   ;;  %488 = vperm.xlu1 %1059, %v450_v13  }
  0x33   : > { %357 = vperm.xlu0 %1058, %v235_v14   ;;  %493 = vperm.xlu1 %1059, %v451_v15   ;;  %v271_v14 = vadd.s32 %v1215_v45, %v254_v4  ;;  %v256_v15 = vadd.s32 56, %v1211_v41 }
  0x35   : > { %vm291_vm5 = vcmp.eq.s32.totalorder %v271_v14, %v1236_v53 }
  0x37   : > { %362 = vperm.xlu0 %1058, %v236_v16   ;;  %498 = vperm.xlu1 %1059, %v452_v17   ;;  %v311_v16 = vsel %vm289_vm3, %v1242_v55, 0.0  ;;  %v257_v17 = vadd.s32 64, %v1211_v41 }
  0x3b   : > { %367 = vperm.xlu0 %1058, %v237_v18   ;;  %503 = vperm.xlu1 %1059, %v453_v19  }
  0x3f   : > { %372 = vperm.xlu0 %1058, %v238_v20   ;;  %508 = vperm.xlu1 %1059, %v454_v21   ;;  %v272_v21 = vadd.s32 %v1215_v45, %v255_v7  ;;  %v279_v7 = vadd.s32 %v1215_v45, %v262_v60 }
  0x41   : > { %vm292_vm6 = vcmp.eq.s32.totalorder %v272_v21, %v1236_v53  ;;  %vm299_vm13 = vcmp.eq.s32.totalorder %v279_v7, %v1236_v53 }
  0x43   : > { %377 = vperm.xlu0 %1058, %v239_v22   ;;  %513 = vperm.xlu1 %1059, %v455_v23  }
  0x47   : > { %382 = vperm.xlu0 %1058, %v240_v24   ;;  %518 = vperm.xlu1 %1059, %v456_v25   ;;  %v273_v25 = vadd.s32 %v1215_v45, %v256_v15 }
  0x49   : > { %vm293_vm7 = vcmp.eq.s32.totalorder %v273_v25, %v1236_v53 }
  0x4a   : > { %v315_v54 = vsel %vm293_vm7, %v1242_v55, 0.0 }
  0x4b   : > { %387 = vperm.xlu0 %1058, %v241_v26   ;;  %523 = vperm.xlu1 %1059, %v457_v27   ;;  %v258_v26 = vadd.s32 72, %v1211_v41  ;;  %v274_v27 = vadd.s32 %v1215_v45, %v257_v17 }
  0x4d   : > { %v275_v42 = vadd.s32 %v1215_v45, %v258_v26  ;;  %vm294_vm8 = vcmp.eq.s32.totalorder %v274_v27, %v1236_v53 }
  0x4f   : > { %392 = vperm.xlu0 %1058, %v242_v28   ;;  %528 = vperm.xlu1 %1059, %v458_v29   ;;  %v259_v28 = vadd.s32 80, %v1211_v41  ;;  %vm295_vm9 = vcmp.eq.s32.totalorder %v275_v42, %v1236_v53 }
  0x53   : > { %397 = vperm.xlu0 %1058, %v243_v30   ;;  %533 = vperm.xlu1 %1059, %v459_v31   ;;  %v312_v31 = vsel %vm290_vm4, %v1242_v55, 0.0 }
  0x57   : > { %402 = vperm.xlu0 %1058, %v244_v32   ;;  %538 = vperm.xlu1 %1059, %v460_v33   ;;  %v313_v32 = vsel %vm291_vm5, %v1242_v55, 0.0 }
  0x96   : > { %v338_v34 = vpop.permute.xlu1 %337  ;;  %v328_v35 = vpop.permute.xlu0 %327 }
  0x97   : > { %v405_v5 = vmul.f32 %v328_v35, %v308_v62  ;;  %v407_v18 = vmul.f32 %v338_v34, %v310_v8  ;;  %v260_v35 = vadd.s32 88, %v1211_v41 }
  0x9a   : > { %v1206_v36 = vpop.permute.xlu1 %342  ;;  %v333_v37 = vpop.permute.xlu0 %332 }
  0x9b   : > { %v406_v2 = vmul.f32 %v333_v37, %v309_v59  ;;  %v408_v29 = vmul.f32 %v1206_v36, %v311_v16  ;;  %v276_v36 = vadd.s32 %v1215_v45, %v259_v28 }
  0x9d   : > { %v421_v12 = vadd.f32 %v406_v2, %v405_v5  ;;  %vm296_vm10 = vcmp.eq.s32.totalorder %v276_v36, %v1236_v53 }
  0x9e   : > { %v1208_v39 = vpop.permute.xlu0 %347  ;;  %v464_v40 = vpop.permute.xlu1 %463  ;;  %v318_v14 = vsel %vm296_vm10, %v1242_v55, 0.0 }
  0x9f   : > { %v541_v3 = vmul.f32 %v464_v40, %v308_v62  ;;  %v422_v24 = vadd.f32 %v421_v12, %v407_v18  ;;  %v409_v46 = vmul.f32 %v1208_v39, %v312_v31  ;;  %v316_v39 = vsel %vm294_vm8, %v1242_v55, 0.0 }
  0xa1   : > { %v423_v37 = vadd.f32 %v422_v24, %v408_v29 }
  0xa2   : > { %v469_v43 = vpop.permute.xlu0 %468  ;;  %v474_v44 = vpop.permute.xlu1 %473 }
  0xa3   : > { %v542_v61 = vmul.f32 %v469_v43, %v309_v59  ;;  %v543_v13 = vmul.f32 %v474_v44, %v310_v8  ;;  %v314_v43 = vsel %vm292_vm6, %v1242_v55, 0.0  ;;  %v261_v44 = vadd.s32 96, %v1211_v41 }
  0xa4   : > { %v277_v59 = vadd.s32 %v1215_v45, %v260_v35 }
  0xa5   : > { %v557_v6 = vadd.f32 %v542_v61, %v541_v3  ;;  %v424_v61 = vadd.f32 %v423_v37, %v409_v46 }
  0xa6   : > { %v479_v48 = vpop.permute.xlu0 %478  ;;  %v484_v49 = vpop.permute.xlu1 %483  ;;  %vm297_vm11 = vcmp.eq.s32.totalorder %v277_v59, %v1236_v53 }
  0xa7   : > { %v558_v19 = vadd.f32 %v557_v6, %v543_v13  ;;  %v544_v20 = vmul.f32 %v479_v48, %v311_v16  ;;  %v545_v40 = vmul.f32 %v484_v49, %v312_v31  ;;  %v317_v6 = vsel %vm295_vm9, %v1242_v55, 0.0 }
  0xa9   : > { %v559_v30 = vadd.f32 %v558_v19, %v544_v20  ;;  %v319_v19 = vsel %vm297_vm11, %v1242_v55, 0.0 }
  0xaa   : > { %v353_v56 = vpop.permute.xlu0 %352  ;;  %v489_v57 = vpop.permute.xlu1 %488 }
  0xab   : > { %v560_v48 = vadd.f32 %v559_v30, %v545_v40  ;;  %v410_v51 = vmul.f32 %v353_v56, %v313_v32  ;;  %v546_v52 = vmul.f32 %v489_v57, %v313_v32  ;;  %v278_v56 = vadd.s32 %v1215_v45, %v261_v44 }
  0xac   : > { %v263_v57 = vadd.s32 112, %v1211_v41  ;;  %v321_v32 = vsel %vm299_vm13, %v1242_v55, 0.0 }
  0xad   : > { %v425_v2 = vadd.f32 %v424_v61, %v410_v51  ;;  %v561_v3 = vadd.f32 %v560_v48, %v546_v52  ;;  %vm298_vm12 = vcmp.eq.s32.totalorder %v278_v56, %v1236_v53 }
  0xae   : > { %v358_v0 = vpop.permute.xlu0 %357  ;;  %v494_v1 = vpop.permute.xlu1 %493  ;;  %v320_v26 = vsel %vm298_vm12, %v1242_v55, 0.0 }
  0xaf   : > { %v411_v62 = vmul.f32 %v358_v0, %v314_v43  ;;  %v547_v63 = vmul.f32 %v494_v1, %v314_v43 }
  0xb1   : > { %v426_v8 = vadd.f32 %v425_v2, %v411_v62  ;;  %v562_v9 = vadd.f32 %v561_v3, %v547_v63 }
  0xb2   : > { %v363_v10 = vpop.permute.xlu0 %362  ;;  %v499_v11 = vpop.permute.xlu1 %498 }
  0xb3   : > { %v412_v4 = vmul.f32 %v363_v10, %v315_v54  ;;  %v548_v5 = vmul.f32 %v499_v11, %v315_v54  ;;  %v280_v10 = vadd.s32 %v1215_v45, %v263_v57  ;;  %v264_v11 = vadd.s32 120, %v1211_v41 }
  0xb5   : > { %v427_v15 = vadd.f32 %v426_v8, %v412_v4  ;;  %v563_v16 = vadd.f32 %v562_v9, %v548_v5  ;;  %vm300_vm14 = vcmp.eq.s32.totalorder %v280_v10, %v1236_v53  ;;  %v281_v27 = vadd.s32 %v1215_v45, %v264_v11  ;;  %v444_v10 = vld [vmem:[#allocation3] sm:$0x1] }
  0xb6   : > { %v368_v22 = vpop.permute.xlu0 %367  ;;  %v504_v23 = vpop.permute.xlu1 %503  ;;  %v322_v43 = vsel %vm300_vm14, %v1242_v55, 0.0 }
  0xb7   : > { %v413_v12 = vmul.f32 %v368_v22, %v316_v39  ;;  %v549_v13 = vmul.f32 %v504_v23, %v316_v39  ;;  %vm301_vm15 = vcmp.eq.s32.totalorder %v281_v27, %v1236_v53 }
  0xb8   : > { %v323_v59 = vsel %vm301_vm15, %v1242_v55, 0.0 }
  0xb9   : > { %v428_v22 = vadd.f32 %v427_v15, %v413_v12  ;;  %v564_v23 = vadd.f32 %v563_v16, %v549_v13 }
  0xba   : > { %v373_v33 = vpop.permute.xlu0 %372  ;;  %v509_v34 = vpop.permute.xlu1 %508 }
  0xbb   : > { %v414_v17 = vmul.f32 %v373_v33, %v317_v6  ;;  %v550_v18 = vmul.f32 %v509_v34, %v317_v6 }
  0xbd   : > { %v429_v28 = vadd.f32 %v428_v22, %v414_v17  ;;  %v565_v29 = vadd.f32 %v564_v23, %v550_v18 }
  0xbe   : > { %v378_v49 = vpop.permute.xlu0 %377  ;;  %v514_v58 = vpop.permute.xlu1 %513 }
  0xbf   : > { %v415_v24 = vmul.f32 %v378_v49, %v318_v14  ;;  %v551_v25 = vmul.f32 %v514_v58, %v318_v14  ;;  %v324_v14 = vld [vmem:[#allocation2] sm:$0x1] }
  0xc1   : > { %v430_v35 = vadd.f32 %v429_v28, %v415_v24  ;;  %v566_v37 = vadd.f32 %v565_v29, %v551_v25 }
  0xc2   : > { %v383_v0 = vpop.permute.xlu0 %382  ;;  %v519_v1 = vpop.permute.xlu1 %518 }
  0xc3   : > { %v416_v30 = vmul.f32 %v383_v0, %v319_v19  ;;  %v552_v31 = vmul.f32 %v519_v1, %v319_v19 }
  0xc5   : > { %v431_v36 = vadd.f32 %v430_v35, %v416_v30  ;;  %v567_v44 = vadd.f32 %v566_v37, %v552_v31 }
  0xc6   : > { %v388_v20 = vpop.permute.xlu0 %387  ;;  %v524_v21 = vpop.permute.xlu1 %523 }
  0xc7   : > { %v417_v40 = vmul.f32 %v388_v20, %v320_v26  ;;  %v553_v42 = vmul.f32 %v524_v21, %v320_v26 }
  0xc9   : > { %v432_v52 = vadd.f32 %v431_v36, %v417_v40  ;;  %v568_v54 = vadd.f32 %v567_v44, %v553_v42 }
  0xca   : > { %v393_v33 = vpop.permute.xlu0 %392  ;;  %v529_v34 = vpop.permute.xlu1 %528 }
  0xcb   : > { %v418_v46 = vmul.f32 %v393_v33, %v321_v32  ;;  %v554_v45 = vmul.f32 %v529_v34, %v321_v32 }
  0xcd   : > { %v433_v60 = vadd.f32 %v432_v52, %v418_v46  ;;  %v569_v61 = vadd.f32 %v568_v54, %v554_v45 }
  0xce   : > { %v398_v48 = vpop.permute.xlu0 %397  ;;  %v534_v51 = vpop.permute.xlu1 %533 }
  0xcf   : > { %v419_v49 = vmul.f32 %v398_v48, %v322_v43  ;;  %v555_v58 = vmul.f32 %v534_v51, %v322_v43 }
  0xd1   : > { %v434_v39 = vadd.f32 %v433_v60, %v419_v49  ;;  %v570_v56 = vadd.f32 %v569_v61, %v555_v58 }
  0xd2   : > { %v403_v62 = vpop.permute.xlu0 %402  ;;  %v539_v63 = vpop.permute.xlu1 %538 }
  0xd3   : > { %v420_v57 = vmul.f32 %v403_v62, %v323_v59  ;;  %v556_v53 = vmul.f32 %v539_v63, %v323_v59 }
  0xd5   : > { %v435_v2 = vadd.f32 %v434_v39, %v420_v57  ;;  %v571_v3 = vadd.f32 %v570_v56, %v556_v53 }
  0xd7   : > { %v436_v4 = vrot.slane %v435_v2, 4  ;;  %v572_v5 = vrot.slane %v571_v3, 4 }
  0xd9   : > { %v437_v6 = vadd.f32 %v436_v4, %v435_v2  ;;  %v573_v0 = vadd.f32 %v572_v5, %v571_v3 }
  0xdb   : > { %v438_v1 = vrot.slane %v437_v6, 2  ;;  %v574_v7 = vrot.slane %v573_v0, 2 }
  0xdd   : > { %v439_v8 = vadd.f32 %v438_v1, %v437_v6  ;;  %v575_v9 = vadd.f32 %v574_v7, %v573_v0 }
  0xdf   : > { %v440_v12 = vrot.slane %v439_v8, 1  ;;  %v576_v13 = vrot.slane %v575_v9, 1 }
  0xe1   : > { %v441_v11 = vadd.f32 %v440_v12, %v439_v8  ;;  %v577_v15 = vadd.f32 %v576_v13, %v575_v9  ;;  %583 = sbr.rel (%p984_p8) target bundleno = 637 (0x27d), region = 40 }
  0xe3   : > { %v442_v16 = vadd.f32 %v441_v11, %v324_v14  ;;  %v578_v17 = vadd.f32 %v577_v15, %v444_v10 }
  0xe5   : > { %443 = vst [vmem:[#allocation2] sm:$0x1] %v442_v16  ;;  %579 = vst [vmem:[#allocation3] sm:$0x1] %v578_v17 }
  0xe6   : > { %v1311_v18 = vand.u32 127, %v248_v38  ;;  %v588_v19 = vmul.u32 8, %v1211_v41  ;;  %v1112_v20 = vmov 0.0   ;;  %vm1113_vm1 = vmmov 0  }
  0xe7   : > { %997 = vmatprep.subr.mxu0 %v1112_v20  ;;  %1002 = vmatprep.subr.mxu1 %v1112_v20  ;;  %v1114_v38 = vmov 1.0   ;;  %vm805_vm4 = vcmask 1043456   ;;  %vm829_vm5 = vcmask 24576   ;;  %v1115_v56 = vmov 0  }
  0xe8   : > { %vm589_vm0 = vcmp.ge.s32.totalorder %v1311_v18, %v588_v19  ;;  %v590_v21 = vadd.s32 8, %v588_v19  ;;  %999 = vmatprep.mubr.msk.f32.mxu0 %vm1113_vm1, %v1112_v20  ;;  %1004 = vmatprep.mubr.msk.f32.mxu1 %vm1113_vm1, %v1112_v20  ;;  %vm861_vm9 = vcmask 27648   ;;  %vm887_vm12 = vcmp.eq.s32.totalorder %v1311_v18, 1 }
  0xe9   : > { %vm886_vm13 = vcmp.eq.s32.totalorder %v1311_v18, 0 }
  0xea   : > { %vm591_vm2 = vcmp.lt.s32.totalorder %v1311_v18, %v590_v21 }
  0xeb   : > { %vm592_vm3 = vmand %vm589_vm0, %vm591_vm2 }
  0xec   : > { %v584_v22 = vld [vmem:[#allocation2] sm:$0x1]  ;;  %998 = vmatpush3.xpose.msk.msra.mxu0 %vm592_vm3, %v1114_v38  ;;  %1003 = vmatpush3.xpose.msk.msra.mxu1 %vm592_vm3, %v1114_v38  ;;  %v593_v41 = vsel %vm592_vm3, 1.0, %v1112_v20  ;;  %v585_v27 = vld [vmem:[#allocation3] sm:$0x1] }
  0xed   : > { %v813_v23 = vrot.slane %v584_v22, %v1219_v47  ;;  %1007 = vmatprep.subr.mxu0 %v1112_v20  ;;  %v804_v24 = vmul.f32 %v593_v41, %v1242_v55 }
  0xef   : > { %v815_v25 = vmul.f32 %v813_v23, %v593_v41  ;;  %1000 = vmatmul.mubr.f32.vlgmr.msra.gmra.mxu0 %v1226_v50  ;;  %1005 = vmatmul.mubr.f32.vlgmr.msra.gmra.mxu1 %v584_v22  ;;  %v806_v26 = vsel %vm805_vm4, %v804_v24, 0.0 }
  0xf0   : > { %1008 = vmatpush3.xpose.msk.msra.mxu0 %vm592_vm3, %v1114_v38  ;;  %1009 = vmatprep.mubr.msk.f32.mxu0 %vm1113_vm1, %v1112_v20 }
  0xf1   : > { %807 = vadd.xlane.f32.xlu0 %v806_v26  ;;  %v816_v28 = vsel %vm805_vm4, %v815_v25, 0.0 }
  0xf3   : > { %1010 = vmatmul.mubr.f32.vlgmr.msra.gmra.mxu0 %v585_v27 }
  0xf5   : > { %817 = vadd.xlane.f32.xlu0 %v816_v28 }
 0x17a   : > { %v808_v29 = vpop.xlane.xlu0 %807 }
 0x17b   : > { %v837_v30 = vmax.f32 %v808_v29, 1.0  ;;  %vm836_vm7 = vcmp.gt.f32.partialorder %v808_v29, 0.0 }
 0x17d   : > { %1060 = vrcp.f32 %v837_v30 }
 0x17e   : > { %v818_v43 = vpop.xlane.xlu0 %817 }
 0x18a   : > { %v1061_v42 = vpop.eup %1060 }
 0x18b   : > { %v839_v44 = vmul.f32 %v1061_v42, %v818_v43 }
 0x18d   : > { %v840_v54 = vsel %vm836_vm7, %v839_v44, 0.0 }
 0x1af   : > { %v660_v31 = vpop.f32.mrf.mxu0  ;;  %v730_v55 = vpop.f32.mrf.mxu1 }
 0x1b0   : > { %vm819_vm6 = vcmp.gt.f32.partialorder %v660_v31, 0.0  ;;  %v820_v50 = vmax.f32 %v660_v31, 1.0 }
 0x1b1   : > { %v1001_v32 = vpop.f32.mrf.mxu0  ;;  %v828_v33 = vsel %vm819_vm6, 1.0, %v1112_v20  ;;  %v1006_v34 = vpop.f32.mrf.mxu1  ;;  %v849_v57 = vsel %vm819_vm6, 1, %v1115_v56 }
 0x1b2   : > { %1062 = vrcp.f32 %v820_v50  ;;  %v830_v35 = vsel %vm829_vm5, %v828_v33, 0.0  ;;  %v853_v53 = vrot.slane %v849_v57, %v1219_v47 }
 0x1b3   : > { %831 = vadd.xlane.f32.xlu1 %v830_v35  ;;  %v800_v37 = vpop.f32.mrf.mxu0 }
 0x1b4   : > { %vm854_vm8 = vcmp.eq.s32.totalorder %v853_v53, 1 }
 0x1b5   : > { %v1011_v40 = vpop.f32.mrf.mxu0  ;;  %vm855_vm10 = vmand %vm836_vm7, %vm854_vm8 }
 0x1bf   : > { %v1063_v36 = vpop.eup %1062 }
 0x1c0   : > { %v822_v46 = vmul.f32 %v1063_v36, %v730_v55  ;;  %v823_v51 = vmul.f32 %v1063_v36, %v800_v37 }
 0x1c2   : > { %v824_v45 = vmul.f32 %v822_v46, %v822_v46  ;;  %v841_v48 = vsel %vm819_vm6, %v822_v46, 0.0 }
 0x1c3   : > { %v845_v52 = vrot.slane %v841_v48, %v1219_v47 }
 0x1c4   : > { %v825_v49 = vsub.f32 %v823_v51, %v824_v45 }
 0x1c5   : > { %v846_v58 = vsub.f32 %v840_v54, %v845_v52 }
 0x1c6   : > { %v826_v59 = vmax.f32 %v825_v49, 0.0 }
 0x1c7   : > { %v856_v60 = vmul.f32 %v846_v58, %v846_v58 }
 0x1c8   : > { %v827_v61 = vsel %vm819_vm6, %v826_v59, 0.0 }
 0x1c9   : > { %v857_v62 = vsub.f32 0.0, %v856_v60  ;;  %v833_v63 = vsel %vm829_vm5, %v827_v61, 0.0 }
 0x1ca   : > { %834 = vadd.xlane.f32.xlu0 %v833_v63 }
 0x1cb   : > { %v858_v39 = vmul.f32 1.442695, %v857_v62 }
 0x1cd   : > { %1064 = vpow2.f32 %v858_v39 }
 0x1da   : > { %v1065_v2 = vpop.eup %1064 }
 0x1db   : > { %v860_v3 = vsel %vm855_vm10, %v1065_v2, 0.0 }
 0x1dc   : > { %v862_v4 = vsel %vm861_vm9, %v860_v3, 0.0 }
 0x1dd   : > { %863 = vadd.xlane.f32.xlu1 %v862_v4 }
 0x23c   : > { %v832_v5 = vpop.xlane.xlu1 %831 }
 0x23d   : > { %v988_v6 = vadd.f32 -1.0, %v832_v5  ;;  %v882_v1 = vmax.f32 %v832_v5, 1.0  ;;  %vm881_vm11 = vcmp.ge.f32.partialorder %v832_v5, 1.0  ;;  %vm876_vm14 = vcmp.ge.f32.partialorder %v832_v5, 2.0 }
 0x23f   : > { %v874_v0 = vmul.f32 %v988_v6, %v832_v5  ;;  %1066 = vrcp.f32 %v882_v1 }
 0x241   : > { %v875_v7 = vmax.f32 %v874_v0, 1.0 }
 0x243   : > { %1068 = vrcp.f32 %v875_v7 }
 0x24c   : > { %v1067_v15 = vpop.eup %1066 }
 0x250   : > { %v1069_v20 = vpop.eup %1068 }
 0x253   : > { %v835_v10 = vpop.xlane.xlu0 %834 }
 0x254   : > { %v884_v17 = vmul.f32 %v1067_v15, %v835_v10 }
 0x256   : > { %v885_v22 = vsel %vm881_vm11, %v884_v17, 0.0 }
 0x257   : > { %v888_v38 = vsel %vm887_vm12, %v885_v22, 0.0 }
 0x266   : > { %v864_v8 = vpop.xlane.xlu1 %863 }
 0x267   : > { %v865_v9 = vsel %vm805_vm4, %v864_v8, 0.0 }
 0x268   : > { %v866_v12 = vrot.slane %v865_v9, 4 }
 0x26a   : > { %v867_v47 = vadd.f32 %v866_v12, %v865_v9 }
 0x26c   : > { %v868_v13 = vrot.slane %v867_v47, 2 }
 0x26e   : > { %v869_v14 = vadd.f32 %v868_v13, %v867_v47 }
 0x270   : > { %v870_v11 = vrot.slane %v869_v14, 1 }
 0x272   : > { %v871_v16 = vadd.f32 %v870_v11, %v869_v14 }
 0x274   : > { %v872_v19 = vsub.f32 %v871_v16, %v832_v5 }
 0x276   : > { %v878_v21 = vmul.f32 %v1069_v20, %v872_v19 }
 0x278   : > { %v879_v23 = vmul.f32 0.5, %v878_v21 }
 0x27a   : > { %v880_v41 = vsel %vm876_vm14, %v879_v23, 0.0 }
 0x27b   : > { %v889_v24 = vsel %vm886_vm13, %v880_v41, %v888_v38 }
 0x27c   : > { %890 = vst [vmem:[%s222_s4] sm:$0x1] %v889_v24 }
 0x27d PF: > { %s13_s16 = sadd.s32 1, %s1108_s16   ;;  %s1361_s12 = smov %s1100_s14 }
 0x27e   : > { %p10_p9 = scmp.ge.s32.totalorder %s13_s16, 10   ;;  %s1362_s13 = smov %s1104_s15 }
 0x27f   : > { %s1363_s14 = smov %s1366_s17  ;;  %s1364_s15 = smov %s1370_s18 }
 0x280   :  { %12 = sbr.rel (!%p10_p9) target bundleno = 3 (0x3), region = 76 }

</bundles_post_ra>
